<compile_context>
chip_gen: v7x
topology: tpu7x:2x2x1
jax: 0.10.0
libtpu: 0.0.40
codegen_flags: <defaults>
</compile_context>

<pallas_src>
import functools

import numpy as np
import jax
import jax.numpy as jnp
from jax import lax
from jax.experimental import pallas as pl
from jax.experimental.pallas import tpu as pltpu


def _loss_kernel(labels_ref, preds_ref, head_oh_ref, cls_ref,
                 da_ref, amiss_ref, dtw_ref, twmiss_ref,
                 out_ref, acc_ref, *, batch, eps):
    t = pl.program_id(0)
    tb = preds_ref.shape[0]

    @pl.when(t == 0)
    def _init():
        acc_ref[...] = jnp.zeros_like(acc_ref)

    # Gather each column's head label with a one-hot matmul (rides the MXU
    # slot; HIGHEST precision keeps the integer result exact).
    label_col = jnp.dot(labels_ref[...], head_oh_ref[...],
                        precision=lax.Precision.HIGHEST,
                        preferred_element_type=jnp.float32)          # [TB, Cp]
    onehot = (jnp.abs(label_col - cls_ref[...]) < 0.5).astype(jnp.float32)

    # Single EUP op per element: log(preds). log(trues), smoothing and weights
    # are pre-folded into the per-column constants da / a_miss / dtw / tw_miss:
    #   loss = trues*w*(log(trues) - log(preds))
    #        = (onehot*da + a_miss) - (onehot*dtw + tw_miss) * log(preds)
    logp = jnp.log(jnp.clip(preds_ref[...], eps, 1.0))
    loss = (onehot * da_ref[...] + amiss_ref[...]
            - (onehot * dtw_ref[...] + twmiss_ref[...]) * logp)      # [TB, Cp]

    # Mask batch-padding rows (row index >= true batch size).
    row = t * tb + lax.broadcasted_iota(jnp.int32, (tb, 1), 0)
    loss = jnp.where(row < batch, loss, 0.0)

    # Steady state: only reduce the sublane/batch axis into the accumulator.
    acc_ref[...] += jnp.sum(loss, axis=0, keepdims=True)             # [1, Cp]

    @pl.when(t == pl.num_programs(0) - 1)
    def _finalize():
        total = jnp.sum(acc_ref[...]) * (1.0 / batch)
        out_ref[...] = total.reshape(1, 1).astype(jnp.float32)


def multicategorical_loss(y_true, y_pred, action_nvec, weights, target_value=0.995):
    eps = 1e-07
    action_nvec = [int(k) for k in action_nvec]
    B, H = y_true.shape
    C = int(np.sum(action_nvec))
    assert y_pred.shape == (B, C)

    # ---- host-side per-column constants (built once, float64 then cast) ----
    tv = float(target_value)
    head_of_col = np.concatenate(
        [np.full(k, i, np.int64) for i, k in enumerate(action_nvec)])
    cls_idx = np.concatenate(
        [np.arange(k, dtype=np.float64) for k in action_nvec])
    smooth = np.concatenate(
        [np.full(k, (1.0 - tv) / k, np.float64) for k in action_nvec])
    w = np.concatenate(
        [np.asarray(weights[i], np.float64).reshape(-1)
         for i in range(len(action_nvec))])
    assert w.shape[0] == C

    hit = np.clip(tv + smooth, eps, 1.0)     # smoothed "1" target, clipped
    miss = np.clip(smooth, eps, 1.0)         # smoothed "0" target, clipped
    tw_hit, tw_miss = hit * w, miss * w
    a_hit, a_miss = tw_hit * np.log(hit), tw_miss * np.log(miss)
    da, dtw = a_hit - a_miss, tw_hit - tw_miss

    # ---- lane-dense padding of the class axis (padded cols contribute 0) ----
    LANE = 128
    Cp = ((C + LANE - 1) // LANE) * LANE

    def pad_c(v, fill):
        return np.pad(v.astype(np.float32), (0, Cp - C),
                      constant_values=np.float32(fill))[None, :]

    cls_p = pad_c(cls_idx, -1.0)
    da_p = pad_c(da, 0.0)
    amiss_p = pad_c(a_miss, 0.0)
    dtw_p = pad_c(dtw, 0.0)
    twmiss_p = pad_c(tw_miss, 0.0)
    head_oh = np.zeros((H, Cp), np.float32)
    head_oh[head_of_col, np.arange(C)] = 1.0

    # ---- batch tiling: ~2 MiB per y_pred tile (double-buffered by Pallas),
    # comfortably under the v7x 64 MiB VMEM while amortizing per-step cost ----
    rows_budget = max(8, min(512, ((2 * 1024 * 1024) // (Cp * 4)) // 8 * 8))
    B8 = ((B + 7) // 8) * 8
    TB = min(rows_budget, B8)
    n_tiles = pl.cdiv(B8, TB)
    B_pad = n_tiles * TB

    labels = jnp.pad(y_true.astype(jnp.float32), ((0, B_pad - B), (0, 0)))
    preds = jnp.pad(y_pred.astype(jnp.float32),
                    ((0, B_pad - B), (0, Cp - C)), constant_values=1.0)

    kernel = functools.partial(_loss_kernel, batch=B, eps=eps)

    out = pl.pallas_call(
        kernel,
        out_shape=jax.ShapeDtypeStruct((1, 1), jnp.float32),
        grid_spec=pltpu.PrefetchScalarGridSpec(
            num_scalar_prefetch=0,
            grid=(n_tiles,),
            in_specs=[
                pl.BlockSpec((TB, H), lambda i: (i, 0)),    # labels (batch-tiled)
                pl.BlockSpec((TB, Cp), lambda i: (i, 0)),   # predicted probs (batch-tiled)
                pl.BlockSpec((H, Cp), lambda i: (0, 0)),    # head one-hot map (resident)
                pl.BlockSpec((1, Cp), lambda i: (0, 0)),    # within-head class index
                pl.BlockSpec((1, Cp), lambda i: (0, 0)),    # da   = w*(hit*log hit - miss*log miss)
                pl.BlockSpec((1, Cp), lambda i: (0, 0)),    # a_miss = w*miss*log miss
                pl.BlockSpec((1, Cp), lambda i: (0, 0)),    # dtw  = w*(hit - miss)
                pl.BlockSpec((1, Cp), lambda i: (0, 0)),    # tw_miss = w*miss
            ],
            out_specs=pl.BlockSpec((1, 1), lambda i: (0, 0)),
            scratch_shapes=[pltpu.VMEM((1, Cp), jnp.float32)],
        ),
        compiler_params=pltpu.CompilerParams(
            dimension_semantics=("arbitrary",),
            vmem_limit_bytes=32 * 1024 * 1024,
        ),
    )(
        labels, preds,
        jnp.asarray(head_oh), jnp.asarray(cls_p),
        jnp.asarray(da_p), jnp.asarray(amiss_p),
        jnp.asarray(dtw_p), jnp.asarray(twmiss_p),
    )
    return out[0, 0]


def _reference(y_true, y_pred, action_nvec, weights, target_value=0.995):
    """Pure-numpy transcription of the PyTorch forward pass."""
    y_true = np.asarray(y_true, np.int32)
    y_pred = np.asarray(y_pred, np.float32)
    eps = 1e-07
    off = 0
    losses = []
    for i, k in enumerate(action_nvec):
        preds = y_pred[:, off:off + k]
        trues = np.zeros((y_true.shape[0], k), np.float32)
        trues[np.arange(y_true.shape[0]), y_true[:, i]] = 1.0
        trues = trues * target_value + (1.0 - target_value) / k
        preds = np.clip(preds, eps, 1.0)
        trues = np.clip(trues, eps, 1.0)
        ww = np.asarray(weights[i], np.float32)
        losses.append(np.sum(trues * np.log(trues / preds) * ww, axis=-1))
        off += k
    return np.mean(np.sum(np.stack(losses), axis=0))


if __name__ == "__main__":
    # Deterministic synthetic config (module __init__ args).
    action_nvec = [4, 3, 6, 5]
    weights = [[1.0 + 0.1 * j for j in range(k)] for k in action_nvec]

    B = 8
    H = len(action_nvec)
    C = sum(action_nvec)

    key = jax.random.PRNGKey(0)
    k1, k2 = jax.random.split(key)
    y_true = jnp.stack(
        [jax.random.randint(jax.random.fold_in(k1, i), (B,), 0, k)
         for i, k in enumerate(action_nvec)],
        axis=1,
    ).astype(jnp.int32)                                               # [B, H]
    y_pred = jax.random.uniform(k2, (B, C), jnp.float32, 0.05, 0.95)  # [B, C]

    loss = multicategorical_loss(y_true, y_pred, action_nvec, weights)
    loss = jax.block_until_ready(loss)

    ref = _reference(np.array(y_true), np.array(y_pred), action_nvec, weights)
    assert np.allclose(float(loss), float(ref), rtol=1e-4, atol=1e-5), (float(loss), float(ref))
    print("KERNEL_OK")
</pallas_src>

<mosaic_0001>
module attributes {stable_mosaic.version = 11 : i64} {
  func.func @_loss_kernel(%arg0: i32, %arg1: memref<8x4xf32, #tpu.memory_space<vmem>>, %arg2: memref<8x128xf32, #tpu.memory_space<vmem>>, %arg3: memref<4x128xf32, #tpu.memory_space<vmem>>, %arg4: memref<1x128xf32, #tpu.memory_space<vmem>>, %arg5: memref<1x128xf32, #tpu.memory_space<vmem>>, %arg6: memref<1x128xf32, #tpu.memory_space<vmem>>, %arg7: memref<1x128xf32, #tpu.memory_space<vmem>>, %arg8: memref<1x128xf32, #tpu.memory_space<vmem>>, %arg9: memref<1x1xf32, #tpu.memory_space<vmem>>, %arg10: memref<1x128xf32, #tpu.memory_space<vmem>>) attributes {dimension_semantics = [#tpu.dimension_semantics<arbitrary>], iteration_bounds = array<i64: 1>, scalar_prefetch = 0 : i64, scratch_operands = 1 : i64, tpu.core_type = #tpu.core_type<tc>, window_params = [{transform_indices = @transform_0, window_bounds = array<i64: 8, 4>}, {transform_indices = @transform_1, window_bounds = array<i64: 8, 128>}, {pipeline_mode = #tpu.pipeline_mode<synchronous>, transform_indices = @transform_2, window_bounds = array<i64: 4, 128>}, {pipeline_mode = #tpu.pipeline_mode<synchronous>, transform_indices = @transform_3, window_bounds = array<i64: 1, 128>}, {pipeline_mode = #tpu.pipeline_mode<synchronous>, transform_indices = @transform_4, window_bounds = array<i64: 1, 128>}, {pipeline_mode = #tpu.pipeline_mode<synchronous>, transform_indices = @transform_5, window_bounds = array<i64: 1, 128>}, {pipeline_mode = #tpu.pipeline_mode<synchronous>, transform_indices = @transform_6, window_bounds = array<i64: 1, 128>}, {pipeline_mode = #tpu.pipeline_mode<synchronous>, transform_indices = @transform_7, window_bounds = array<i64: 1, 128>}, {pipeline_mode = #tpu.pipeline_mode<synchronous>, transform_indices = @transform_8, window_bounds = array<i64: 1, 1>}]} {
    %c0_i32 = arith.constant 0 : i32
    %0 = arith.cmpi eq, %arg0, %c0_i32 : i32
    %1 = arith.extui %0 : i1 to i32
    %c0_i32_0 = arith.constant 0 : i32
    %2 = arith.cmpi ne, %1, %c0_i32_0 : i32
    scf.if %2 {
      %cst_28 = arith.constant 0.000000e+00 : f32
      %52 = vector.broadcast %cst_28 : f32 to vector<1x128xf32>
      %c0_29 = arith.constant 0 : index
      %c0_30 = arith.constant 0 : index
      %53 = vector.load %arg10[%c0_29, %c0_30] : memref<1x128xf32, #tpu.memory_space<vmem>>, vector<1x128xf32>
      tpu.vector_store %arg10[%c0_29, %c0_30], %52 {strides = array<i32>} : memref<1x128xf32, #tpu.memory_space<vmem>>, vector<1x128xf32>,
    } else {
    }
    %c0 = arith.constant 0 : index
    %c0_1 = arith.constant 0 : index
    %3 = vector.load %arg1[%c0, %c0_1] : memref<8x4xf32, #tpu.memory_space<vmem>>, vector<8x4xf32>
    %c0_2 = arith.constant 0 : index
    %c0_3 = arith.constant 0 : index
    %4 = vector.load %arg3[%c0_2, %c0_3] : memref<4x128xf32, #tpu.memory_space<vmem>>, vector<4x128xf32>
    %cst = arith.constant dense<0.000000e+00> : vector<8x128xf32>
    %5 = tpu.matmul %3, %4, %cst {dimension_numbers = #tpu.dot_dimension_numbers<[1], [0], [0], [1], [0, 0, 1, 1], [], []>, precision = #tpu.contract_precision<fp32>} : vector<8x4xf32>, vector<4x128xf32>, vector<8x128xf32> -> vector<8x128xf32>
    %c0_4 = arith.constant 0 : index
    %c0_5 = arith.constant 0 : index
    %6 = vector.load %arg4[%c0_4, %c0_5] : memref<1x128xf32, #tpu.memory_space<vmem>>, vector<1x128xf32>
    %7 = vector.broadcast %6 : vector<1x128xf32> to vector<8x128xf32>
    %8 = arith.subf %5, %7 : vector<8x128xf32>
    %9 = math.absf %8 : vector<8x128xf32>
    %cst_6 = arith.constant 5.000000e-01 : f32
    %10 = vector.broadcast %cst_6 : f32 to vector<8x128xf32>
    %11 = arith.cmpf olt, %9, %10 : vector<8x128xf32>
    %12 = arith.extui %11 : vector<8x128xi1> to vector<8x128xi32>
    %13 = arith.sitofp %12 : vector<8x128xi32> to vector<8x128xf32>
    %c0_7 = arith.constant 0 : index
    %c0_8 = arith.constant 0 : index
    %14 = vector.load %arg2[%c0_7, %c0_8] : memref<8x128xf32, #tpu.memory_space<vmem>>, vector<8x128xf32>
    %cst_9 = arith.constant 1.000000e-07 : f32
    %cst_10 = arith.constant 1.000000e+00 : f32
    %15 = vector.broadcast %cst_9 : f32 to vector<8x128xf32>
    %16 = arith.maximumf %15, %14 : vector<8x128xf32>
    %17 = vector.broadcast %cst_10 : f32 to vector<8x128xf32>
    %18 = arith.minimumf %17, %16 : vector<8x128xf32>
    %19 = math.log %18 : vector<8x128xf32>
    %c0_11 = arith.constant 0 : index
    %c0_12 = arith.constant 0 : index
    %20 = vector.load %arg5[%c0_11, %c0_12] : memref<1x128xf32, #tpu.memory_space<vmem>>, vector<1x128xf32>
    %21 = vector.broadcast %20 : vector<1x128xf32> to vector<8x128xf32>
    %22 = arith.mulf %13, %21 : vector<8x128xf32>
    %c0_13 = arith.constant 0 : index
    %c0_14 = arith.constant 0 : index
    %23 = vector.load %arg6[%c0_13, %c0_14] : memref<1x128xf32, #tpu.memory_space<vmem>>, vector<1x128xf32>
    %24 = vector.broadcast %23 : vector<1x128xf32> to vector<8x128xf32>
    %25 = arith.addf %22, %24 : vector<8x128xf32>
    %c0_15 = arith.constant 0 : index
    %c0_16 = arith.constant 0 : index
    %26 = vector.load %arg7[%c0_15, %c0_16] : memref<1x128xf32, #tpu.memory_space<vmem>>, vector<1x128xf32>
    %27 = vector.broadcast %26 : vector<1x128xf32> to vector<8x128xf32>
    %28 = arith.mulf %13, %27 : vector<8x128xf32>
    %c0_17 = arith.constant 0 : index
    %c0_18 = arith.constant 0 : index
    %29 = vector.load %arg8[%c0_17, %c0_18] : memref<1x128xf32, #tpu.memory_space<vmem>>, vector<1x128xf32>
    %30 = vector.broadcast %29 : vector<1x128xf32> to vector<8x128xf32>
    %31 = arith.addf %28, %30 : vector<8x128xf32>
    %32 = arith.mulf %31, %19 : vector<8x128xf32>
    %33 = arith.subf %25, %32 : vector<8x128xf32>
    %c8_i32 = arith.constant 8 : i32
    %34 = arith.muli %arg0, %c8_i32 : i32
    %35 = tpu.iota {dimensions = array<i32: 0>} : vector<8x1xi32>
    %36 = vector.broadcast %34 : i32 to vector<8x1xi32>
    %37 = arith.addi %36, %35 : vector<8x1xi32>
    %c8_i32_19 = arith.constant 8 : i32
    %38 = vector.broadcast %c8_i32_19 : i32 to vector<8x1xi32>
    %39 = arith.cmpi slt, %37, %38 : vector<8x1xi32>
    %cst_20 = arith.constant 0.000000e+00 : f32
    %40 = vector.shape_cast %39 : vector<8x1xi1> to vector<8x1xi1>
    %41 = vector.broadcast %40 : vector<8x1xi1> to vector<8x128xi1>
    %42 = vector.broadcast %cst_20 : f32 to vector<8x128xf32>
    %43 = arith.select %41, %33, %42 : vector<8x128xi1>, vector<8x128xf32>
    %c0_21 = arith.constant 0 : index
    %c0_22 = arith.constant 0 : index
    %44 = vector.load %arg10[%c0_21, %c0_22] : memref<1x128xf32, #tpu.memory_space<vmem>>, vector<1x128xf32>
    %cst_23 = arith.constant dense<0.000000e+00> : vector<128xf32>
    %45 = vector.multi_reduction <add>, %43, %cst_23 [0] : vector<8x128xf32> to vector<128xf32>
    %46 = vector.shape_cast %45 : vector<128xf32> to vector<1x128xf32>
    %47 = arith.addf %44, %46 : vector<1x128xf32>
    %c0_24 = arith.constant 0 : index
    %c0_25 = arith.constant 0 : index
    %48 = vector.load %arg10[%c0_24, %c0_25] : memref<1x128xf32, #tpu.memory_space<vmem>>, vector<1x128xf32>
    tpu.vector_store %arg10[%c0_24, %c0_25], %47 {strides = array<i32>} : memref<1x128xf32, #tpu.memory_space<vmem>>, vector<1x128xf32>,
    %c0_i32_26 = arith.constant 0 : i32
    %49 = arith.cmpi eq, %arg0, %c0_i32_26 : i32
    %50 = arith.extui %49 : i1 to i32
    %c0_i32_27 = arith.constant 0 : i32
    %51 = arith.cmpi ne, %50, %c0_i32_27 : i32
    scf.if %51 {
      %c0_28 = arith.constant 0 : index
      %c0_29 = arith.constant 0 : index
      %52 = vector.load %arg10[%c0_28, %c0_29] : memref<1x128xf32, #tpu.memory_space<vmem>>, vector<1x128xf32>
      %53 = vector.shape_cast %52 : vector<1x128xf32> to vector<1x1x128xf32>
      %cst_30 = arith.constant dense<0.000000e+00> : vector<1xf32>
      %54 = vector.multi_reduction <add>, %53, %cst_30 [1, 2] : vector<1x1x128xf32> to vector<1xf32>
      %55 = vector.shape_cast %54 : vector<1xf32> to vector<1x1x1xf32>
      %56 = vector.extract %55[0, 0, 0] : f32 from vector<1x1x1xf32>
      %cst_31 = arith.constant 1.250000e-01 : f32
      %57 = arith.mulf %56, %cst_31 : f32
      %58 = vector.broadcast %57 : f32 to vector<1x1xf32>
      %c0_32 = arith.constant 0 : index
      %c0_33 = arith.constant 0 : index
      %59 = vector.load %arg9[%c0_32, %c0_33] : memref<1x1xf32, #tpu.memory_space<vmem>>, vector<1x1xf32>
      tpu.vector_store %arg9[%c0_32, %c0_33], %58 {strides = array<i32>} : memref<1x1xf32, #tpu.memory_space<vmem>>, vector<1x1xf32>,
    } else {
    }
    return
  }
  func.func @transform_0(%arg0: i32) -> (i32, i32) {
    %c0_i32 = arith.constant 0 : i32
    %c0_i32_0 = arith.constant 0 : i32
    return %arg0, %c0_i32 : i32, i32
  }
  func.func @transform_1(%arg0: i32) -> (i32, i32) {
    %c0_i32 = arith.constant 0 : i32
    %c0_i32_0 = arith.constant 0 : i32
    return %arg0, %c0_i32 : i32, i32
  }
  func.func @transform_2(%arg0: i32) -> (i32, i32) {
    %c0_i32 = arith.constant 0 : i32
    %c0_i32_0 = arith.constant 0 : i32
    %c0_i32_1 = arith.constant 0 : i32
    return %c0_i32, %c0_i32_0 : i32, i32
  }
  func.func @transform_3(%arg0: i32) -> (i32, i32) {
    %c0_i32 = arith.constant 0 : i32
    %c0_i32_0 = arith.constant 0 : i32
    %c0_i32_1 = arith.constant 0 : i32
    return %c0_i32, %c0_i32_0 : i32, i32
  }
  func.func @transform_4(%arg0: i32) -> (i32, i32) {
    %c0_i32 = arith.constant 0 : i32
    %c0_i32_0 = arith.constant 0 : i32
    %c0_i32_1 = arith.constant 0 : i32
    return %c0_i32, %c0_i32_0 : i32, i32
  }
  func.func @transform_5(%arg0: i32) -> (i32, i32) {
    %c0_i32 = arith.constant 0 : i32
    %c0_i32_0 = arith.constant 0 : i32
    %c0_i32_1 = arith.constant 0 : i32
    return %c0_i32, %c0_i32_0 : i32, i32
  }
  func.func @transform_6(%arg0: i32) -> (i32, i32) {
    %c0_i32 = arith.constant 0 : i32
    %c0_i32_0 = arith.constant 0 : i32
    %c0_i32_1 = arith.constant 0 : i32
    return %c0_i32, %c0_i32_0 : i32, i32
  }
  func.func @transform_7(%arg0: i32) -> (i32, i32) {
    %c0_i32 = arith.constant 0 : i32
    %c0_i32_0 = arith.constant 0 : i32
    %c0_i32_1 = arith.constant 0 : i32
    return %c0_i32, %c0_i32_0 : i32, i32
  }
  func.func @transform_8(%arg0: i32) -> (i32, i32) {
    %c0_i32 = arith.constant 0 : i32
    %c0_i32_0 = arith.constant 0 : i32
    %c0_i32_1 = arith.constant 0 : i32
    return %c0_i32, %c0_i32_0 : i32, i32
  }
}

</mosaic_0001>

<bundles_post_ra>
// kernel: tpu_custom_call.1
= control target key start
LH: loop header
LB: loop body
LE: loop exit
PB: predicated region body
PF: predicated region fallthrough
CT: control target
= control target key end

     0   :  { %vm41_vm0 = vcmask 1043456   ;;  %v681_v2 = vmov 0.0   ;;  %vm682_vm1 = vmmov 0   ;;  %vm37_vm2 = vcmask 31744   ;;  %s771_s0 = inlined_call_operand.vmem [shape: f32[8,4], index: 0, kind: input, shape index: {}]   ;;  %s772_s1 = inlined_call_operand.vmem [shape: f32[8,128], index: 1, kind: input, shape index: {}]   ;;  %s773_s2 = inlined_call_operand.vmem [shape: f32[4,128], index: 2, kind: input, shape index: {}]   ;;  %s774_s3 = inlined_call_operand.vmem [shape: f32[1,128], index: 3, kind: input, shape index: {}]   ;;  %s775_s4 = inlined_call_operand.vmem [shape: f32[1,128], index: 4, kind: input, shape index: {}]   ;;  %s776_s5 = inlined_call_operand.vmem [shape: f32[1,128], index: 5, kind: input, shape index: {}]   ;;  %s777_s6 = inlined_call_operand.vmem [shape: f32[1,128], index: 6, kind: input, shape index: {}]   ;;  %s778_s7 = inlined_call_operand.vmem [shape: f32[1,128], index: 7, kind: input, shape index: {}]   ;;  %s779_s8 = inlined_call_operand.hbm [shape: f32[1,1], index: 8, kind: output, shape index: {}]  }
   0x1   :  { %v36_v0 = vld [vmem:[%s773_s2] sm:$0xf]  ;;  %626 = vmatprep.subr.mxu0 %v681_v2  ;;  %34 = vst [vmem:[#allocation2] sm:$0x1] %v681_v2  ;;  %628 = vmatprep.mubr.msk.f32.mxu0 %vm682_vm1, %v681_v2 }
   0x2   :  { %v35_v1 = vld [vmem:[%s771_s0] sm:$0xff]  ;;  %v43_v3 = vsel %vm41_vm0, %v36_v0, 0 }
   0x3   :  { %13 = vsyncpa [#allocation4], 0  ;;  %v46_v4 = vand.u32 4294901760, %v43_v3  ;;  %v39_v5 = vsel %vm37_vm2, %v35_v1, 0  ;;  %611 = vmatprep.subr.mxu1 %v681_v2  ;;  %613 = vmatprep.mubr.msk.f32.mxu1 %vm682_vm1, %v681_v2  ;;  %v503_v15 = vld [vmem:[%s772_s1] sm:$0xff]  ;;  %vm564_vm4 = vcmask 1040384  }
   0x4   :  { %v111_v6 = vand.u32 4294901760, %v39_v5  ;;  %v504_v16 = vmax.f32 %v503_v15, 1e-07  ;;  %v593_v21 = vld [vmem:[%s774_s3] ss:$0 sm:$0xff]  ;;  %vm577_vm5 = vcmask 0  }
   0x5   :  { %v123_v7 = vsub.f32 %v43_v3, %v46_v4  ;;  %627 = vmatpush3.msra.mxu0 %v46_v4  ;;  %612 = vmatpush3.msra.mxu1 %v46_v4  ;;  %v595_v27 = vld [vmem:[%s775_s4] ss:$0 sm:$0xff]  ;;  %s683_s4 = smov [#allocation3]  }
   0x6   :  { %v112_v8 = vsub.f32 %v39_v5, %v111_v6  ;;  %616 = vmatprep.subr.mxu1 %v681_v2  ;;  %631 = vmatprep.subr.mxu0 %v681_v2  ;;  %v505_v17 = vmin.f32 %v504_v16, 1.0  ;;  %v597_v28 = vld [vmem:[%s777_s6] ss:$0 sm:$0xff] }
   0x7   :  { %v124_v9 = vand.u32 4294901760, %v123_v7  ;;  %v598_v30 = vld [vmem:[%s778_s7] ss:$0 sm:$0xff] }
   0x8   :  { %v113_v10 = vand.u32 4294901760, %v112_v8  ;;  %655 = vlog2.f32 %v505_v17  ;;  %v596_v34 = vld [vmem:[%s776_s5] ss:$0 sm:$0xff]  ;;  %v551_v44 = vld [vmem:[#allocation2] sm:$0x1]  ;;  %s585_s5 = sshll.u32 %s683_s4, 4  ;;  %s586_s5 = int_to_ptr.vmem [resolvable:$true] %s585_s5 }
   0x9   :  { %v125_v11 = vsub.f32 %v123_v7, %v124_v9  ;;  %s657_s17 = scalar_lea.vmem %s586_s5, 16  ;;  %s661_s18 = scalar_lea.vmem %s586_s5, 32 }
   0xa   :  { %629 = vmatmul.mubr.f32.vlgmr.msra.gmra.mrb[0].mxu0 %v113_v10  ;;  %v114_v12 = vsub.f32 %v112_v8, %v113_v10  ;;  %p658_p0 = scmp.ne.s32.totalorder %s586_s5, %s657_s17  ;;  %p662_p1 = scmp.lt.s32.totalorder %s586_s5, %s586_s5 }
   0xb   :  { %v126_v13 = vand.u32 4294901760, %v125_v11  ;;  %632 = vmatpush3.msra.mxu0 %v124_v9  ;;  %633 = vmatprep.mubr.msk.f32.mxu0 %vm682_vm1, %v681_v2  ;;  %p663_p2 = scmp.lt.s32.totalorder %s661_s18, %s657_s17 }
   0xc   :  { %v115_v14 = vand.u32 4294901760, %v114_v12  ;;  %636 = vmatprep.subr.mxu0 %v681_v2 }
   0xd   :  { %p664_p3 = por %p663_p2, %p662_p1 }
   0xe   :  { %614 = vmatmul.mubr.f32.vlgmr.msra.gmra.mrb[0].mxu1 %v115_v14 }
   0xf   :  { %617 = vmatpush3.msra.mxu1 %v126_v13  ;;  %618 = vmatprep.mubr.msk.f32.mxu1 %vm682_vm1, %v681_v2  ;;  %p665_p4 = pnand %p664_p3, %p658_p0 }
  0x10   :  { %621 = vmatprep.subr.mxu1 %v681_v2 }
  0x12   :  { %634 = vmatmul.mubr.f32.vlgmr.msra.gmra.mrb[0].mxu0 %v111_v6  ;;  %v656_v26 = vpop.eup %655 }
  0x13   :  { %637 = vmatpush3.msra.mxu0 %v46_v4  ;;  %638 = vmatprep.mubr.msk.f32.mxu0 %vm682_vm1, %v681_v2  ;;  %v507_v31 = vmul.f32 0.6931472, %v656_v26 }
  0x16   :  { %619 = vmatmul.mubr.f32.vlgmr.msra.gmra.mrb[0].mxu1 %v111_v6 }
  0x17   :  { %622 = vmatpush3.msra.mxu1 %v123_v7  ;;  %623 = vmatprep.mubr.msk.f32.mxu1 %vm682_vm1, %v681_v2 }
  0x1a   :  { %639 = vmatmul.mubr.f32.vlgmr.msra.gmra.mrb[0].mxu0 %v111_v6 }
  0x1e   :  { %624 = vmatmul.mubr.f32.vlgmr.msra.gmra.mrb[0].mxu1 %v112_v8 }
  0xed   :  { %v487_v18 = vpop.f32.mrb[0].mxu0 }
  0xee   :  { %v640_v19 = vpop.f32.mrb[1].mxu0 }
  0xf1   :  { %v267_v20 = vpop.f32.mrb[0].mxu1 }
  0xf2   :  { %v641_v22 = vadd.f32 %v487_v18, %v267_v20  ;;  %v625_v23 = vpop.f32.mrb[1].mxu1 }
  0xf4   :  { %v498_v24 = vsub.f32 %v641_v22, %v593_v21 }
  0xf6   :  { %v499_v25 = vand.u32 2147483647, %v498_v24 }
  0xf8   :  { %vm500_vm3 = vcmp.lt.f32.partialorder %v499_v25, 0.5 }
  0xf9   :  { %v594_v29 = vsel %vm500_vm3, 1.0, %v681_v2 }
  0xfa   :  { %v515_v32 = vmul.f32 %v595_v27, %v594_v29  ;;  %v531_v33 = vmul.f32 %v597_v28, %v594_v29 }
  0xfc   :  { %v539_v35 = vadd.f32 %v598_v30, %v531_v33  ;;  %v523_v36 = vadd.f32 %v596_v34, %v515_v32 }
  0xfe   :  { %v540_v37 = vmul.f32 %v539_v35, %v507_v31 }
 0x100   :  { %v541_v38 = vsub.f32 %v523_v36, %v540_v37 }
 0x102   :  { %v552_v39 = vrot.slane %v541_v38, 4 }
 0x104   :  { %v553_v40 = vadd.f32 %v552_v39, %v541_v38 }
 0x106   :  { %v554_v41 = vrot.slane %v553_v40, 2 }
 0x108   :  { %v555_v42 = vadd.f32 %v554_v41, %v553_v40 }
 0x10a   :  { %v556_v43 = vrot.slane %v555_v42, 1 }
 0x10c   :  { %v557_v45 = vadd.f32 %v556_v43, %v555_v42 }
 0x10e   :  { %v558_v46 = vadd.f32 %v557_v45, %v551_v44 }
 0x110   :  { %559 = vst [vmem:[#allocation2] sm:$0x1] %v558_v46 }
 0x117   :  { %v563_v47 = vld [vmem:[#allocation2] sm:$0x1] }
 0x118   :  { %v565_v48 = vsel %vm564_vm4, %v563_v47, 0.0 }
 0x119   :  { %566 = vadd.xlane.f32.xlu0 %v565_v48 }
 0x1a6   :  { %v567_v49 = vpop.xlane.xlu0 %566 }
 0x1a7   :  { %v568_v50 = vrot.slane %v567_v49, 4 }
 0x1a9   :  { %v569_v51 = vadd.f32 %v568_v50, %v567_v49 }
 0x1ab   :  { %v570_v52 = vrot.slane %v569_v51, 2 }
 0x1ad   :  { %v571_v53 = vadd.f32 %v570_v52, %v569_v51 }
 0x1af   :  { %v572_v54 = vrot.slane %v571_v53, 1 }
 0x1b1   :  { %v573_v55 = vadd.f32 %v572_v54, %v571_v53 }
 0x1b3   :  { %650 = vpush %v573_v55 }
 0x1e4   :  { %s651_s6 = spop %650 }
 0x1e5   :  { %s575_s7 = smul.f32 0.125, %s651_s6 }
 0x1e7   :  { %v576_v56 = vstv %s575_s7 }
 0x1e8   :  { %578 = vst.msk [vmem:[#allocation3] sm:$0x1] %vm577_vm5, %v576_v56 }
 0x1e9   :  { %668 = shalt.err (!%p665_p4)
}
 0x1ea   :  { %s669_s21 = scalar_lea.hbm %s779_s8, 16 }
 0x1eb   :  { %p670_p5 = scmp.ne.s32.totalorder %s779_s8, %s669_s21  ;;  %p673_p6 = scmp.lt.u32.totalorder %s669_s21, %s779_s8 }
 0x1ed   :  { %p675_p7 = pnand %p673_p6, %p670_p5 }
 0x1ef   :  { %678 = shalt.err (!%p675_p7)
}
 0x1f0   :  { %588 = dma.vmem_to_hbm [thread:$0]  %s586_s5, 16, %s779_s8, [#allocation4]  }
 0x1f1   :  { %679 = dma.done.wait [#allocation4], 16  }
 0x1f2   :  { %680 = vsyncadd [#allocation4], 4294967280 }
 0x1f3   :  { %592 = vsyncpa [#allocation4], 1 }

</bundles_post_ra>
